<compile_context>
chip_gen: v5e
topology: v5e:2x2
jax: 0.10.0
libtpu: 0.0.40
codegen_flags: <defaults>
</compile_context>

<pallas_src>
import jax
import jax.numpy as jnp
from jax.experimental import pallas as pl
from jax.experimental.pallas import tpu as pltpu


def _round_up(v, m):
    return -(-v // m) * m


def mlp_kernel(x_ref, w1_ref, b1_ref, w2_ref, b2_ref, o_ref):
    # fc1 (MXU): activations already arrive in the weight dtype when the
    # wrapper chose a bf16 streaming path; accumulate in f32 regardless.
    x = x_ref[...]
    w1 = w1_ref[...]
    if x.dtype != w1.dtype:
        x = x.astype(w1.dtype)
    h = jnp.dot(x, w1, preferred_element_type=jnp.float32)

    # bias + ReLU in f32 (VPU).  b1 is [1, H] and broadcasts over the batch tile.
    h = jnp.maximum(h + b1_ref[...].astype(jnp.float32), 0.0)

    # fc2 (MXU), casting into the dot only if the weights are lower precision.
    w2 = w2_ref[...]
    h2 = h if w2.dtype == jnp.float32 else h.astype(w2.dtype)
    out = jnp.dot(h2, w2, preferred_element_type=jnp.float32)
    out = out + b2_ref[...].astype(jnp.float32)

    o_ref[...] = out.astype(o_ref.dtype)


def simple_network_forward(x, w1, b1, w2, b2, *, block_b=1024, out_dtype=None):
    """Fused MLP forward.

    x : [B, D_in]
    w1: [D_in, H]   b1: [1, H]      (transposed vs. PyTorch's [out, in])
    w2: [H, D_out]  b2: [1, D_out]
    """
    B, D_in = x.shape
    H = w1.shape[1]
    D_out = w2.shape[1]
    if out_dtype is None:
        out_dtype = x.dtype

    # Stream x at the weight precision when the weights are narrower (bf16 on
    # v6e/v7x): halves the dominant HBM stream; accumulation stays f32.
    if (w1.dtype != x.dtype
            and jnp.dtype(w1.dtype).itemsize < jnp.dtype(x.dtype).itemsize):
        x_in = x.astype(w1.dtype)
    else:
        x_in = x

    x_isz = jnp.dtype(x_in.dtype).itemsize
    o_isz = jnp.dtype(out_dtype).itemsize
    w_isz = jnp.dtype(w1.dtype).itemsize
    b_isz = jnp.dtype(b1.dtype).itemsize

    # ---- batch tiling -------------------------------------------------------
    block_b = max(8, block_b)
    n_tiles = pl.cdiv(B, block_b)
    # v7x has 2 TensorCores: make sure the "parallel" batch axis has >= 2 tiles
    # to shard across them (negligible cost on single-TC v5e/v6e).
    if n_tiles == 1 and B >= 16:
        n_tiles = 2
    TB = _round_up(pl.cdiv(B, n_tiles), 8)

    # Cap TB by a VMEM budget: 2x double-buffered (x tile + out tile) plus
    # double-buffered resident weights/biases must stay well inside every
    # generation's scoped VMEM (v7x: 64 MiB physical / 32 MiB scoped default).
    VMEM_BUDGET = 20 << 20
    act_row_bytes = D_in * x_isz + D_out * o_isz
    resident_bytes = 2 * ((D_in * H + H * D_out) * w_isz + (H + D_out) * b_isz)
    max_tb = (VMEM_BUDGET - resident_bytes) // (2 * act_row_bytes)
    max_tb = max(8, (max_tb // 8) * 8)
    if TB > max_tb:
        TB = max_tb
        n_tiles = pl.cdiv(B, TB)
    B_pad = n_tiles * TB          # batch padding is < TB rows (usually < 8)

    if B_pad != B:
        x_in = jnp.pad(x_in, ((0, B_pad - B), (0, 0)))

    b1_2d = b1.reshape(1, H)
    b2_2d = b2.reshape(1, D_out)

    # ---- cost / compiler params --------------------------------------------
    bytes_accessed = (B_pad * D_in * x_isz + B_pad * D_out * o_isz
                      + (D_in * H + H * D_out) * w_isz + (H + D_out) * b_isz)
    cost = pl.CostEstimate(
        flops=2 * B_pad * (D_in * H + H * D_out),
        transcendentals=0,
        bytes_accessed=bytes_accessed,
    )
    vmem_needed = 2 * TB * act_row_bytes + resident_bytes
    vmem_limit = int(min(48 << 20, max(32 << 20, vmem_needed + (4 << 20))))

    # ---- pallas call --------------------------------------------------------
    out_p = pl.pallas_call(
        mlp_kernel,
        out_shape=jax.ShapeDtypeStruct((B_pad, D_out), out_dtype),
        grid_spec=pl.GridSpec(
            grid=(n_tiles,),
            in_specs=[
                pl.BlockSpec((TB, D_in), lambda i: (i, 0)),    # x tile (full D_in)
                pl.BlockSpec((D_in, H), lambda i: (0, 0)),     # w1 (VMEM-resident)
                pl.BlockSpec((1, H), lambda i: (0, 0)),        # b1 (resident)
                pl.BlockSpec((H, D_out), lambda i: (0, 0)),    # w2 (resident)
                pl.BlockSpec((1, D_out), lambda i: (0, 0)),    # b2 (resident)
            ],
            out_specs=pl.BlockSpec((TB, D_out), lambda i: (i, 0)),
        ),
        compiler_params=pltpu.CompilerParams(
            dimension_semantics=("parallel",),   # shards batch tiles on v7x's 2 TCs
            vmem_limit_bytes=vmem_limit,
        ),
        cost_estimate=cost,
    )(x_in, w1, b1_2d, w2, b2_2d)

    return out_p[:B] if B_pad != B else out_p


def init_params(key, input_size, hidden_size, output_size, dtype=jnp.float32):
    """Init matching nn.Linear default U(-1/sqrt(fan_in), +1/sqrt(fan_in)).

    Weights are stored transposed vs. PyTorch's [out, in] so the kernel does
    plain x @ W row-major matmuls.  Pass dtype=jnp.bfloat16 on v6e/v7x for the
    fast MXU / half-bandwidth path (accumulation stays f32 inside the kernel).
    """
    k1, k2, k3, k4 = jax.random.split(key, 4)
    bound1 = 1.0 / (input_size ** 0.5)
    bound2 = 1.0 / (hidden_size ** 0.5)
    w1 = jax.random.uniform(k1, (input_size, hidden_size), jnp.float32, -bound1, bound1)
    b1 = jax.random.uniform(k2, (1, hidden_size), jnp.float32, -bound1, bound1)
    w2 = jax.random.uniform(k3, (hidden_size, output_size), jnp.float32, -bound2, bound2)
    b2 = jax.random.uniform(k4, (1, output_size), jnp.float32, -bound2, bound2)
    return (w1.astype(dtype), b1.astype(dtype), w2.astype(dtype), b2.astype(dtype))


if __name__ == "__main__":
    key = jax.random.PRNGKey(0)
    kx, kp = jax.random.split(key)

    batch = 8
    input_size = 32
    hidden_size = 128        # fixed by the module
    output_size = 16

    x = jax.random.normal(kx, (batch, input_size), jnp.float32)

    # --- f32 weights: strict correctness check --------------------------------
    w1, b1, w2, b2 = init_params(kp, input_size, hidden_size, output_size,
                                 dtype=jnp.float32)
    out = simple_network_forward(x, w1, b1, w2, b2)
    out = jax.block_until_ready(out)

    ref = jnp.maximum(x @ w1 + b1, 0.0) @ w2 + b2
    assert out.shape == (batch, output_size)
    assert jnp.allclose(out, ref, atol=1e-5, rtol=1e-5), "f32 mismatch"

    # --- bf16 weights (v6e/v7x bandwidth path): relaxed-tolerance check -------
    w1b, b1b, w2b, b2b = init_params(kp, input_size, hidden_size, output_size,
                                     dtype=jnp.bfloat16)
    out_bf = simple_network_forward(x, w1b, b1b, w2b, b2b)
    out_bf = jax.block_until_ready(out_bf)

    xb = x.astype(jnp.bfloat16).astype(jnp.float32)
    w1f, b1f = w1b.astype(jnp.float32), b1b.astype(jnp.float32)
    w2f, b2f = w2b.astype(jnp.float32), b2b.astype(jnp.float32)
    h_ref = jnp.maximum(xb @ w1f + b1f, 0.0)
    ref_bf = h_ref.astype(jnp.bfloat16).astype(jnp.float32) @ w2f + b2f
    assert out_bf.shape == (batch, output_size)
    assert jnp.allclose(out_bf, ref_bf, atol=1e-2, rtol=1e-2), "bf16 mismatch"

    # --- awkward batch size: exercises <8-row padding + multi-tile grid -------
    x_big = jax.random.normal(kx, (520, input_size), jnp.float32)
    out_big = simple_network_forward(x_big, w1, b1, w2, b2, block_b=256)
    out_big = jax.block_until_ready(out_big)
    ref_big = jnp.maximum(x_big @ w1 + b1, 0.0) @ w2 + b2
    assert out_big.shape == (520, output_size)
    assert jnp.allclose(out_big, ref_big, atol=1e-5, rtol=1e-5), "tiled mismatch"

    print("KERNEL_OK")
</pallas_src>

<mosaic_0001>
module attributes {stable_mosaic.version = 11 : i64} {
  func.func @mlp_kernel(%arg0: i32, %arg1: memref<8x32xf32, #tpu.memory_space<vmem>>, %arg2: memref<32x128xf32, #tpu.memory_space<vmem>>, %arg3: memref<1x128xf32, #tpu.memory_space<vmem>>, %arg4: memref<128x16xf32, #tpu.memory_space<vmem>>, %arg5: memref<1x16xf32, #tpu.memory_space<vmem>>, %arg6: memref<8x16xf32, #tpu.memory_space<vmem>>) attributes {dimension_semantics = [#tpu.dimension_semantics<parallel>], iteration_bounds = array<i64: 1>, scalar_prefetch = 0 : i64, scratch_operands = 0 : i64, tpu.core_type = #tpu.core_type<tc>, window_params = [{transform_indices = @transform_0, window_bounds = array<i64: 8, 32>}, {pipeline_mode = #tpu.pipeline_mode<synchronous>, transform_indices = @transform_1, window_bounds = array<i64: 32, 128>}, {pipeline_mode = #tpu.pipeline_mode<synchronous>, transform_indices = @transform_2, window_bounds = array<i64: 1, 128>}, {pipeline_mode = #tpu.pipeline_mode<synchronous>, transform_indices = @transform_3, window_bounds = array<i64: 128, 16>}, {pipeline_mode = #tpu.pipeline_mode<synchronous>, transform_indices = @transform_4, window_bounds = array<i64: 1, 16>}, {transform_indices = @transform_5, window_bounds = array<i64: 8, 16>}]} {
    %c0 = arith.constant 0 : index
    %c0_0 = arith.constant 0 : index
    %0 = vector.load %arg1[%c0, %c0_0] : memref<8x32xf32, #tpu.memory_space<vmem>>, vector<8x32xf32>
    %c0_1 = arith.constant 0 : index
    %c0_2 = arith.constant 0 : index
    %1 = vector.load %arg2[%c0_1, %c0_2] : memref<32x128xf32, #tpu.memory_space<vmem>>, vector<32x128xf32>
    %cst = arith.constant dense<0.000000e+00> : vector<8x128xf32>
    %2 = tpu.matmul %0, %1, %cst {dimension_numbers = #tpu.dot_dimension_numbers<[1], [0], [0], [1], [0, 0, 1, 1], [], []>} : vector<8x32xf32>, vector<32x128xf32>, vector<8x128xf32> -> vector<8x128xf32>
    %c0_3 = arith.constant 0 : index
    %c0_4 = arith.constant 0 : index
    %3 = vector.load %arg3[%c0_3, %c0_4] : memref<1x128xf32, #tpu.memory_space<vmem>>, vector<1x128xf32>
    %4 = vector.broadcast %3 : vector<1x128xf32> to vector<8x128xf32>
    %5 = arith.addf %2, %4 : vector<8x128xf32>
    %cst_5 = arith.constant 0.000000e+00 : f32
    %6 = vector.broadcast %cst_5 : f32 to vector<8x128xf32>
    %7 = arith.maximumf %5, %6 : vector<8x128xf32>
    %c0_6 = arith.constant 0 : index
    %c0_7 = arith.constant 0 : index
    %8 = vector.load %arg4[%c0_6, %c0_7] : memref<128x16xf32, #tpu.memory_space<vmem>>, vector<128x16xf32>
    %cst_8 = arith.constant dense<0.000000e+00> : vector<8x16xf32>
    %9 = tpu.matmul %7, %8, %cst_8 {dimension_numbers = #tpu.dot_dimension_numbers<[1], [0], [0], [1], [0, 0, 1, 1], [], []>} : vector<8x128xf32>, vector<128x16xf32>, vector<8x16xf32> -> vector<8x16xf32>
    %c0_9 = arith.constant 0 : index
    %c0_10 = arith.constant 0 : index
    %10 = vector.load %arg5[%c0_9, %c0_10] : memref<1x16xf32, #tpu.memory_space<vmem>>, vector<1x16xf32>
    %11 = vector.broadcast %10 : vector<1x16xf32> to vector<8x16xf32>
    %12 = arith.addf %9, %11 : vector<8x16xf32>
    %c0_11 = arith.constant 0 : index
    %c0_12 = arith.constant 0 : index
    %13 = vector.load %arg6[%c0_11, %c0_12] : memref<8x16xf32, #tpu.memory_space<vmem>>, vector<8x16xf32>
    tpu.vector_store %arg6[%c0_11, %c0_12], %12 {strides = array<i32>} : memref<8x16xf32, #tpu.memory_space<vmem>>, vector<8x16xf32>,
    return
  }
  func.func @transform_0(%arg0: i32) -> (i32, i32) {
    %c0_i32 = arith.constant 0 : i32
    %c0_i32_0 = arith.constant 0 : i32
    return %arg0, %c0_i32 : i32, i32
  }
  func.func @transform_1(%arg0: i32) -> (i32, i32) {
    %c0_i32 = arith.constant 0 : i32
    %c0_i32_0 = arith.constant 0 : i32
    %c0_i32_1 = arith.constant 0 : i32
    return %c0_i32, %c0_i32_0 : i32, i32
  }
  func.func @transform_2(%arg0: i32) -> (i32, i32) {
    %c0_i32 = arith.constant 0 : i32
    %c0_i32_0 = arith.constant 0 : i32
    %c0_i32_1 = arith.constant 0 : i32
    return %c0_i32, %c0_i32_0 : i32, i32
  }
  func.func @transform_3(%arg0: i32) -> (i32, i32) {
    %c0_i32 = arith.constant 0 : i32
    %c0_i32_0 = arith.constant 0 : i32
    %c0_i32_1 = arith.constant 0 : i32
    return %c0_i32, %c0_i32_0 : i32, i32
  }
  func.func @transform_4(%arg0: i32) -> (i32, i32) {
    %c0_i32 = arith.constant 0 : i32
    %c0_i32_0 = arith.constant 0 : i32
    %c0_i32_1 = arith.constant 0 : i32
    return %c0_i32, %c0_i32_0 : i32, i32
  }
  func.func @transform_5(%arg0: i32) -> (i32, i32) {
    %c0_i32 = arith.constant 0 : i32
    %c0_i32_0 = arith.constant 0 : i32
    return %arg0, %c0_i32 : i32, i32
  }
}

</mosaic_0001>

<bundles_post_ra>
// kernel: tpu_custom_call.1
= control target key start
LH: loop header
LB: loop body
LE: loop exit
PB: predicated region body
PF: predicated region fallthrough
CT: control target
= control target key end

     0   :  { %vm30_vm0 = vcmask 261120   ;;  %s246_s0 = inlined_call_operand.vmem [shape: f32[8,32], index: 0, kind: input, shape index: {}]   ;;  %s247_s1 = inlined_call_operand.vmem [shape: f32[32,128], index: 1, kind: input, shape index: {}]   ;;  %s248_s2 = inlined_call_operand.vmem [shape: f32[1,128], index: 2, kind: input, shape index: {}]   ;;  %s249_s3 = inlined_call_operand.vmem [shape: f32[128,16], index: 3, kind: input, shape index: {}]   ;;  %s250_s4 = inlined_call_operand.vmem [shape: f32[1,16], index: 4, kind: input, shape index: {}]   ;;  %s251_s5 = inlined_call_operand.hbm [shape: f32[8,16], index: 5, kind: output, shape index: {}]  }
   0x1   :  { %v25_v0 = vld [vmem:[%s247_s1 + $0x18] sm:$0xff]  ;;  %v24_v1 = vld [vmem:[%s247_s1 + $0x10] sm:$0xff]  ;;  %v23_v3 = vld [vmem:[%s247_s1 + $0x8] sm:$0xff] }
   0x2   :  { %46 = vmatpush.msra.mxu0 %v25_v0  ;;  %v70_v2 = vld [vmem:[%s249_s3 + $0x78] sm:$0xff]  ;;  %v69_v4 = vld [vmem:[%s249_s3 + $0x70] sm:$0xff]  ;;  %v68_v5 = vld [vmem:[%s249_s3 + $0x68] sm:$0xff] }
   0x3   :  { %75 = vmatpush.msra.mxu1 %v70_v2  ;;  %v22_v6 = vld [vmem:[%s247_s1] sm:$0xff]  ;;  %v66_v9 = vld [vmem:[%s249_s3 + $0x58] sm:$0xff] }
   0x4   :  { %47 = vmatpush.msra.mxu0 %v24_v1  ;;  %v21_v7 = vld [vmem:[%s246_s0] sm:$0xff] }
   0x5   :  { %76 = vmatpush.msra.mxu1 %v69_v4  ;;  %v67_v8 = vld [vmem:[%s249_s3 + $0x60] sm:$0xff] }
   0x6   :  { %48 = vmatpush.msra.mxu0 %v23_v3 }
   0x7   :  { %77 = vmatpush.msra.mxu1 %v68_v5 }
   0x8   :  { %49 = vmatpush.msra.mxu0 %v22_v6 }
   0x9   :  { %10 = vsyncpa [#allocation3], 0  ;;  %113 = vmatmul.msk.f32.vlgmr.msra.gmra.mxu0 %vm30_vm0, %v21_v7  ;;  %78 = vmatpush.msra.mxu1 %v67_v8  ;;  %v65_v10 = vld [vmem:[%s249_s3 + $0x50] sm:$0xff]  ;;  %v64_v11 = vld [vmem:[%s249_s3 + $0x48] sm:$0xff]  ;;  %s143_s12 = smov [#allocation2]   ;;  %s104_s14 = sshll.u32 %s251_s5, 4  ;;  %s105_s14 = int_to_ptr.hbm [resolvable:$true] %s104_s14 }
   0xa   :  { %v63_v12 = vld [vmem:[%s249_s3 + $0x40] sm:$0xff]  ;;  %v62_v13 = vld [vmem:[%s249_s3 + $0x38] sm:$0xff]  ;;  %v61_v14 = vld [vmem:[%s249_s3 + $0x30] sm:$0xff]  ;;  %s102_s1 = sshll.u32 %s143_s12, 4  ;;  %vm95_vm1 = vcmask 130048   ;;  %s103_s1 = int_to_ptr.vmem [resolvable:$true] %s102_s1 }
   0xb   :  { %79 = vmatpush.msra.mxu1 %v66_v9  ;;  %v60_v15 = vld [vmem:[%s249_s3 + $0x28] sm:$0xff]  ;;  %v59_v16 = vld [vmem:[%s249_s3 + $0x20] sm:$0xff]  ;;  %v58_v17 = vld [vmem:[%s249_s3 + $0x18] sm:$0xff] }
   0xc   :  { %v57_v18 = vld [vmem:[%s249_s3 + $0x10] sm:$0xff]  ;;  %v56_v19 = vld [vmem:[%s249_s3 + $0x8] sm:$0xff]  ;;  %v55_v20 = vld [vmem:[%s249_s3] sm:$0xff] }
   0xd   :  { %80 = vmatpush.msra.mxu1 %v65_v10  ;;  %v115_v21 = vld [vmem:[%s248_s2] ss:$0 sm:$0xff] }
   0xe   :  { %v116_v25 = vld [vmem:[%s250_s4] ss:$0 sm:$0xff] }
   0xf   :  { %81 = vmatpush.msra.mxu1 %v64_v11 }
  0x11   :  { %82 = vmatpush.msra.mxu1 %v63_v12 }
  0x13   :  { %83 = vmatpush.msra.mxu1 %v62_v13 }
  0x15   :  { %84 = vmatpush.msra.mxu1 %v61_v14 }
  0x17   :  { %85 = vmatpush.msra.mxu1 %v60_v15 }
  0x19   :  { %86 = vmatpush.msra.mxu1 %v59_v16 }
  0x1b   :  { %87 = vmatpush.msra.mxu1 %v58_v17 }
  0x1d   :  { %88 = vmatpush.msra.mxu1 %v57_v18 }
  0x1f   :  { %89 = vmatpush.msra.mxu1 %v56_v19 }
  0x21   :  { %90 = vmatpush.msra.mxu1 %v55_v20 }
  0x86   :  { %v51_v22 = vpop.f32.mrf.mxu0 }
  0x87   :  { %v52_v23 = vadd.f32 %v115_v21, %v51_v22 }
  0x89   :  { %v54_v24 = vmax.f32 %v52_v23, 0.0 }
  0x8b   :  { %91 = vmatmul.f32.vlgmr.msra.gmra.mxu1 %v54_v24 }
 0x108   :  { %v92_v26 = vpop.f32.mrf.mxu1 }
 0x109   :  { %v93_v27 = vadd.f32 %v116_v25, %v92_v26 }
 0x10b   :  { %96 = vst.msk [vmem:[#allocation2] sm:$0xff] %vm95_vm1, %v93_v27 }
 0x10c   :  { %107 = dma.vmem_to_hbm [thread:$0]  %s103_s1, 128, %s105_s14, [#allocation3]  }
 0x10d   :  { %141 = dma.done.wait [#allocation3], 128  }
 0x10e   :  { %142 = vsyncadd [#allocation3], 4294967168 }
 0x10f   :  { %112 = vsyncpa [#allocation3], 1 }

</bundles_post_ra>
